<compile_context>
chip_gen: v7x
topology: tpu7x:2x2x1
jax: 0.10.0
libtpu: 0.0.40
codegen_flags: <defaults>
</compile_context>

<pallas_src>
import jax
import jax.numpy as jnp
from jax.experimental import pallas as pl
from jax.experimental.pallas import tpu as pltpu

CONFIG = {
    "num_of_in_features": 10,
    "num_of_out_features": 1,
}
RND_MEAN = 0.0
RND_STD = 0.003

PACK = 64                 # samples packed per row: 64 * 10 = 640 lanes = 5 full vregs
DEFAULT_ROW_TILE = 2048   # 2048 rows * 640 * 4B = 5 MiB input per grid step
                          # (~10 MiB double-buffered: fits v5e's 16 MiB scoped default;
                          #  bump to 4096-6144 + vmem_limit_bytes on v6e/v7x if desired)
SMALL_MAX_B = 16384       # native (B,10) layout pads lanes 10->128 in VMEM (B*512 B)


def _packed_linear_kernel(x_ref, wbd_ref, b_ref, o_ref):
    # x_ref:   (TILE_R, PACK*IN) VMEM  -- 64 samples per row, fully lane-dense
    # wbd_ref: (PACK*IN, PACK)   VMEM  -- block-diagonal weights (w on each 10x1 block)
    # b_ref:   (1, 1)            SMEM  -- scalar bias
    # o_ref:   (TILE_R, PACK)    VMEM  -- 64 per-sample outputs per row
    acc = jnp.dot(x_ref[...], wbd_ref[...], preferred_element_type=jnp.float32)
    o_ref[...] = (acc + b_ref[0, 0]).astype(o_ref.dtype)


def _small_linear_kernel(x_ref, w_ref, b_ref, o_ref):
    # x_ref: (B, IN) VMEM (native layout, no transpose), w_ref: (1, IN) VMEM,
    # b_ref: (1, 1) SMEM, o_ref: (B, 1) VMEM.
    prod = x_ref[...] * w_ref[...]                    # VPU, sublane-broadcast of w
    acc = jnp.sum(prod, axis=1, keepdims=True)        # XLU lane reduce over IN=10
    o_ref[...] = (acc + b_ref[0, 0]).astype(o_ref.dtype)


def _round_up(n, m):
    return ((n + m - 1) // m) * m


def _forward_packed(x, w, b, row_tile):
    """Packed path: requires B % PACK == 0."""
    B, IN = x.shape
    R = B // PACK
    # Free bitcast reshape (x is contiguous row-major): 64 samples per 640-lane row.
    xp = x.reshape(R, PACK * IN)
    # Block-diagonal weight: W_bd[i*IN+k, j] = (i==j) * w[0, k]  -> (640, 64).
    w_bd = jnp.kron(jnp.eye(PACK, dtype=x.dtype), jnp.transpose(w))
    b_smem = jnp.reshape(b, (1, 1))

    if R > row_tile:
        tile = row_tile
    elif R >= 16:
        tile = _round_up(pl.cdiv(R, 2), 8)   # >= 2 grid steps: both v7x TCs get work
    else:
        tile = R                             # full-extent block (legal for any R)
    grid = (pl.cdiv(R, tile),)

    cost = pl.CostEstimate(
        flops=2 * R * (PACK * IN) * PACK,
        bytes_accessed=4 * (R * PACK * IN + PACK * IN * PACK + 1 + R * PACK),
        transcendentals=0,
    )

    out = pl.pallas_call(
        _packed_linear_kernel,
        out_shape=jax.ShapeDtypeStruct((R, PACK), jnp.float32),
        grid=grid,
        in_specs=[
            pl.BlockSpec((tile, PACK * IN), lambda i: (i, 0)),
            pl.BlockSpec((PACK * IN, PACK), lambda i: (0, 0)),   # resident weights
            pl.BlockSpec(memory_space=pltpu.MemorySpace.SMEM),   # scalar bias
        ],
        out_specs=pl.BlockSpec((tile, PACK), lambda i: (i, 0)),
        compiler_params=pltpu.CompilerParams(
            dimension_semantics=("parallel",),
        ),
        cost_estimate=cost,
    )(xp, w_bd, b_smem)

    return out.reshape(B, 1)   # free bitcast back to (B, OUT)


def _forward_small(x, w, b):
    """Gridless path for small B in native (B, IN) layout (any B)."""
    B, IN = x.shape
    w_row = jnp.reshape(w, (1, IN))
    b_smem = jnp.reshape(b, (1, 1))
    cost = pl.CostEstimate(
        flops=2 * B * IN,
        bytes_accessed=4 * (B * IN + IN + 1 + B),
        transcendentals=0,
    )
    return pl.pallas_call(
        _small_linear_kernel,
        out_shape=jax.ShapeDtypeStruct((B, 1), jnp.float32),
        in_specs=[
            pl.BlockSpec(memory_space=pltpu.MemorySpace.VMEM),
            pl.BlockSpec(memory_space=pltpu.MemorySpace.VMEM),
            pl.BlockSpec(memory_space=pltpu.MemorySpace.SMEM),
        ],
        out_specs=pl.BlockSpec(memory_space=pltpu.MemorySpace.VMEM),
        cost_estimate=cost,
    )(x, w_row, b_smem)


def neural_net_forward(x, w, b, *, row_tile=DEFAULT_ROW_TILE):
    """Pallas forward of NeuralNet: y = x @ w.T + b.

    x: (B, IN) f32, w: (OUT, IN) f32, b: (OUT,) f32, returns (B, OUT) f32.
    Specialized for OUT == 1 (fixed by the module config).
    """
    B, IN = x.shape
    OUT = w.shape[0]
    assert OUT == 1, "kernel specialized for num_of_out_features == 1"
    assert IN == w.shape[1]

    if B % PACK == 0:
        return _forward_packed(x, w, b, row_tile)
    if B <= SMALL_MAX_B:
        return _forward_small(x, w, b)
    # Large ragged B: pad to a multiple of PACK (one extra copy of x; prefer batch
    # sizes that are multiples of 64 to stay on the zero-copy packed path).
    pad = (-B) % PACK
    xp = jnp.concatenate([x, jnp.zeros((pad, IN), x.dtype)], axis=0)
    return _forward_packed(xp, w, b, row_tile)[:B]


def init_params(key):
    """Mirror NeuralNet.__init__: weight ~ N(RND_MEAN, RND_STD) of shape (OUT, IN),
    bias = zeros(OUT)."""
    IN = CONFIG["num_of_in_features"]
    OUT = CONFIG["num_of_out_features"]
    w = RND_MEAN + RND_STD * jax.random.normal(key, (OUT, IN), dtype=jnp.float32)
    b = jnp.zeros((OUT,), dtype=jnp.float32)
    return w, b


if __name__ == "__main__":
    key = jax.random.PRNGKey(0)
    k_w, k1, k2, k3 = jax.random.split(key, 4)

    IN = CONFIG["num_of_in_features"]
    OUT = CONFIG["num_of_out_features"]

    w, b = init_params(k_w)
    fwd = jax.jit(neural_net_forward, static_argnames=("row_tile",))

    # 1) Module's natural batch (B=100, not a multiple of 64): gridless native path.
    x1 = jax.random.normal(k1, (100, IN), dtype=jnp.float32)
    y1 = jax.block_until_ready(fwd(x1, w, b))
    y1_ref = x1 @ w.T + b
    assert y1.shape == (100, OUT)
    assert jnp.allclose(y1, y1_ref, atol=1e-4, rtol=1e-3)

    # 2) B=128 (multiple of 64): packed lane-dense path, single-step grid.
    x2 = jax.random.normal(k2, (128, IN), dtype=jnp.float32)
    y2 = jax.block_until_ready(fwd(x2, w, b))
    y2_ref = x2 @ w.T + b
    assert y2.shape == (128, OUT)
    assert jnp.allclose(y2, y2_ref, atol=1e-4, rtol=1e-3)

    # 3) Exercise the multi-step gridded path (including a partial last block) at a
    #    small size by forcing a tiny row_tile (R = 20 packed rows, 3 grid steps).
    x3 = jax.random.normal(k3, (1280, IN), dtype=jnp.float32)
    y3 = jax.block_until_ready(fwd(x3, w, b, row_tile=8))
    y3_ref = x3 @ w.T + b
    assert y3.shape == (1280, OUT)
    assert jnp.allclose(y3, y3_ref, atol=1e-4, rtol=1e-3)

    print("KERNEL_OK")
</pallas_src>

<mosaic_0001>
module attributes {stable_mosaic.version = 11 : i64} {
  func.func @_small_linear_kernel(%arg0: memref<100x10xf32, #tpu.memory_space<vmem>>, %arg1: memref<1x10xf32, #tpu.memory_space<vmem>>, %arg2: memref<1x1xf32, #tpu.memory_space<smem>>, %arg3: memref<100x1xf32, #tpu.memory_space<vmem>>) attributes {dimension_semantics = [], scalar_prefetch = 0 : i64, scratch_operands = 0 : i64, tpu.core_type = #tpu.core_type<tc>} {
    %c0 = arith.constant 0 : index
    %c0_0 = arith.constant 0 : index
    %0 = vector.load %arg0[%c0, %c0_0] : memref<100x10xf32, #tpu.memory_space<vmem>>, vector<100x10xf32>
    %c0_1 = arith.constant 0 : index
    %c0_2 = arith.constant 0 : index
    %1 = vector.load %arg1[%c0_1, %c0_2] : memref<1x10xf32, #tpu.memory_space<vmem>>, vector<1x10xf32>
    %2 = vector.broadcast %1 : vector<1x10xf32> to vector<100x10xf32>
    %3 = arith.mulf %0, %2 : vector<100x10xf32>
    %cst = arith.constant dense<0.000000e+00> : vector<100xf32>
    %4 = vector.multi_reduction <add>, %3, %cst [1] : vector<100x10xf32> to vector<100xf32>
    %5 = vector.shape_cast %4 : vector<100xf32> to vector<100x1xf32>
    %c0_3 = arith.constant 0 : index
    %c0_4 = arith.constant 0 : index
    %6 = memref.load %arg2[%c0_3, %c0_4] : memref<1x1xf32, #tpu.memory_space<smem>>
    %7 = vector.broadcast %6 : f32 to vector<100x1xf32>
    %8 = arith.addf %5, %7 : vector<100x1xf32>
    %c0_5 = arith.constant 0 : index
    %c0_6 = arith.constant 0 : index
    %9 = vector.load %arg3[%c0_5, %c0_6] : memref<100x1xf32, #tpu.memory_space<vmem>>, vector<100x1xf32>
    tpu.vector_store %arg3[%c0_5, %c0_6], %8 {strides = array<i32>} : memref<100x1xf32, #tpu.memory_space<vmem>>, vector<100x1xf32>,
    return
  }
}

</mosaic_0001>

<bundles_post_ra>
// kernel: neural_net_forward.1
= control target key start
LH: loop header
LB: loop body
LE: loop exit
PB: predicated region body
PF: predicated region fallthrough
CT: control target
= control target key end

     0   :  { %vm48_vm0 = vcmask 80896   ;;  %vm85_vm1 = vcmask 76800   ;;  %vm104_vm2 = vcmask 7168   ;;  %vm117_vm3 = vcmask 3072   ;;  %s252_s0 = inlined_call_operand.vmem [shape: f32[100,10], index: 0, kind: input, shape index: {}]   ;;  %s253_s1 = inlined_call_operand.vmem [shape: f32[1,10], index: 1, kind: input, shape index: {}]   ;;  %s254_s2 = inlined_call_operand.<no memory space> [shape: f32[1,1], index: 2, kind: input, shape index: {}]   ;;  %s255_s3 = inlined_call_operand.vmem [shape: f32[100,1], index: 3, kind: output, shape index: {}]  }
   0x1   :  { %v15_v0 = vld [vmem:[%s252_s0] sm:$0xff]  ;;  %v17_v2 = vld [vmem:[%s252_s0 + $0x10] sm:$0xff]  ;;  %v16_v5 = vld [vmem:[%s252_s0 + $0x8] sm:$0xff]  ;;  %v90_v40 = vstv %s254_s2 }
   0x2   :  { %v123_v1 = vld [vmem:[%s253_s1] ss:$0 sm:$0xff]  ;;  %v18_v6 = vld [vmem:[%s252_s0 + $0x18] sm:$0xff]  ;;  %v20_v10 = vld [vmem:[%s252_s0 + $0x28] sm:$0xff] }
   0x3   :  { %v35_v3 = vmul.f32 %v123_v1, %v15_v0  ;;  %v37_v4 = vmul.f32 %v123_v1, %v17_v2  ;;  %v36_v7 = vmul.f32 %v123_v1, %v16_v5  ;;  %v38_v8 = vmul.f32 %v123_v1, %v18_v6  ;;  %v19_v9 = vld [vmem:[%s252_s0 + $0x20] sm:$0xff]  ;;  %v21_v17 = vld [vmem:[%s252_s0 + $0x30] sm:$0xff]  ;;  %v22_v18 = vld [vmem:[%s252_s0 + $0x38] sm:$0xff] }
   0x4   :  { %v39_v15 = vmul.f32 %v123_v1, %v19_v9  ;;  %v40_v16 = vmul.f32 %v123_v1, %v20_v10  ;;  %v41_v21 = vmul.f32 %v123_v1, %v21_v17  ;;  %v42_v22 = vmul.f32 %v123_v1, %v22_v18  ;;  %v23_v23 = vld [vmem:[%s252_s0 + $0x40] sm:$0xff]  ;;  %v24_v24 = vld [vmem:[%s252_s0 + $0x48] sm:$0xff]  ;;  %v25_v29 = vld [vmem:[%s252_s0 + $0x50] sm:$0xff] }
   0x5   :  { %v49_v11 = vsel %vm48_vm0, %v35_v3, 0.0  ;;  %v55_v12 = vsel %vm48_vm0, %v37_v4, 0.0  ;;  %v52_v13 = vsel %vm48_vm0, %v36_v7, 0.0  ;;  %v58_v14 = vsel %vm48_vm0, %v38_v8, 0.0  ;;  %v26_v30 = vld [vmem:[%s252_s0 + $0x58] sm:$0xff] }
   0x6   :  { %50 = vadd.xlane.f32.xlu0 %v49_v11  ;;  %56 = vadd.xlane.f32.xlu1 %v55_v12  ;;  %v61_v19 = vsel %vm48_vm0, %v39_v15, 0.0  ;;  %v64_v20 = vsel %vm48_vm0, %v40_v16, 0.0  ;;  %v67_v25 = vsel %vm48_vm0, %v41_v21, 0.0  ;;  %v70_v26 = vsel %vm48_vm0, %v42_v22, 0.0  ;;  %v27_v35 = vld [vmem:[%s252_s0 + $0x60] sm:$0xf] }
   0x7   :  { %v43_v27 = vmul.f32 %v123_v1, %v23_v23  ;;  %v44_v28 = vmul.f32 %v123_v1, %v24_v24  ;;  %v45_v33 = vmul.f32 %v123_v1, %v25_v29  ;;  %v46_v34 = vmul.f32 %v123_v1, %v26_v30 }
   0x8   :  { %v47_v38 = vmul.f32 %v123_v1, %v27_v35 }
   0x9   :  { %v73_v31 = vsel %vm48_vm0, %v43_v27, 0.0  ;;  %v76_v32 = vsel %vm48_vm0, %v44_v28, 0.0  ;;  %v79_v36 = vsel %vm48_vm0, %v45_v33, 0.0  ;;  %v82_v37 = vsel %vm48_vm0, %v46_v34, 0.0 }
   0xa   :  { %53 = vadd.xlane.f32.xlu0 %v52_v13  ;;  %59 = vadd.xlane.f32.xlu1 %v58_v14  ;;  %v86_v39 = vsel %vm85_vm1, %v47_v38, 0.0 }
   0xe   :  { %62 = vadd.xlane.f32.xlu0 %v61_v19  ;;  %65 = vadd.xlane.f32.xlu1 %v64_v20 }
  0x12   :  { %68 = vadd.xlane.f32.xlu0 %v67_v25  ;;  %71 = vadd.xlane.f32.xlu1 %v70_v26 }
  0x16   :  { %74 = vadd.xlane.f32.xlu0 %v73_v31  ;;  %77 = vadd.xlane.f32.xlu1 %v76_v32 }
  0x1a   :  { %80 = vadd.xlane.f32.xlu0 %v79_v36  ;;  %83 = vadd.xlane.f32.xlu1 %v82_v37 }
  0x1e   :  { %87 = vadd.xlane.f32.xlu0 %v86_v39 }
  0x93   :  { %v51_v41 = vpop.xlane.xlu0 %50  ;;  %v57_v42 = vpop.xlane.xlu1 %56 }
  0x94   :  { %v91_v43 = vadd.f32 %v90_v40, %v51_v41  ;;  %v93_v44 = vadd.f32 %v90_v40, %v57_v42 }
  0x96   :  { %105 = vst.msk [vmem:[%s255_s3] sm:$0xff] %vm104_vm2, %v91_v43  ;;  %107 = vst.msk [vmem:[%s255_s3 + $0x10] sm:$0xff] %vm104_vm2, %v93_v44 }
  0x97   :  { %v54_v45 = vpop.xlane.xlu0 %53  ;;  %v60_v46 = vpop.xlane.xlu1 %59 }
  0x98   :  { %v92_v47 = vadd.f32 %v90_v40, %v54_v45  ;;  %v94_v48 = vadd.f32 %v90_v40, %v60_v46 }
  0x9a   :  { %106 = vst.msk [vmem:[%s255_s3 + $0x8] sm:$0xff] %vm104_vm2, %v92_v47  ;;  %108 = vst.msk [vmem:[%s255_s3 + $0x18] sm:$0xff] %vm104_vm2, %v94_v48 }
  0x9b   :  { %v63_v49 = vpop.xlane.xlu0 %62  ;;  %v66_v50 = vpop.xlane.xlu1 %65 }
  0x9c   :  { %v95_v51 = vadd.f32 %v90_v40, %v63_v49  ;;  %v96_v52 = vadd.f32 %v90_v40, %v66_v50 }
  0x9e   :  { %109 = vst.msk [vmem:[%s255_s3 + $0x20] sm:$0xff] %vm104_vm2, %v95_v51  ;;  %110 = vst.msk [vmem:[%s255_s3 + $0x28] sm:$0xff] %vm104_vm2, %v96_v52 }
  0x9f   :  { %v69_v53 = vpop.xlane.xlu0 %68  ;;  %v72_v54 = vpop.xlane.xlu1 %71 }
  0xa0   :  { %v97_v55 = vadd.f32 %v90_v40, %v69_v53  ;;  %v98_v56 = vadd.f32 %v90_v40, %v72_v54 }
  0xa2   :  { %111 = vst.msk [vmem:[%s255_s3 + $0x30] sm:$0xff] %vm104_vm2, %v97_v55  ;;  %112 = vst.msk [vmem:[%s255_s3 + $0x38] sm:$0xff] %vm104_vm2, %v98_v56 }
  0xa3   :  { %v75_v57 = vpop.xlane.xlu0 %74  ;;  %v78_v58 = vpop.xlane.xlu1 %77 }
  0xa4   :  { %v99_v59 = vadd.f32 %v90_v40, %v75_v57  ;;  %v100_v60 = vadd.f32 %v90_v40, %v78_v58 }
  0xa6   :  { %113 = vst.msk [vmem:[%s255_s3 + $0x40] sm:$0xff] %vm104_vm2, %v99_v59  ;;  %114 = vst.msk [vmem:[%s255_s3 + $0x48] sm:$0xff] %vm104_vm2, %v100_v60 }
  0xa7   :  { %v81_v61 = vpop.xlane.xlu0 %80  ;;  %v84_v62 = vpop.xlane.xlu1 %83 }
  0xa8   :  { %v101_v63 = vadd.f32 %v90_v40, %v81_v61  ;;  %v102_v0 = vadd.f32 %v90_v40, %v84_v62 }
  0xaa   :  { %115 = vst.msk [vmem:[%s255_s3 + $0x50] sm:$0xff] %vm104_vm2, %v101_v63  ;;  %116 = vst.msk [vmem:[%s255_s3 + $0x58] sm:$0xff] %vm104_vm2, %v102_v0 }
  0xab   :  { %v88_v1 = vpop.xlane.xlu0 %87 }
  0xac   :  { %v103_v2 = vadd.f32 %v90_v40, %v88_v1 }
  0xae   :  { %118 = vst.msk [vmem:[%s255_s3 + $0x60] sm:$0xf] %vm117_vm3, %v103_v2 }

</bundles_post_ra>
